<compile_context>
chip_gen: v7x
topology: tpu7x:2x2x1
jax: 0.10.0
libtpu: 0.0.40
codegen_flags: <defaults>
</compile_context>

<pallas_src>
import functools

import jax
import jax.numpy as jnp
from jax.experimental import pallas as pl
from jax.experimental.pallas import tpu as pltpu


_VMEM_LIMIT_BYTES = 32 * 1024 * 1024        # scoped-VMEM request (safe v5e/v6e/v7x)
_VMEM_WORKING_SET_BUDGET = 20 * 1024 * 1024 # input-block working-set budget
_MAX_SPATIAL_TILE = 32768                   # lanes per spatial tile cap


def _dice_sums_kernel(p_ref, t_ref, inter_out, gnd_out, prd_out,
                      *, total_elems, tile, apply_sigmoid, squared_pred,
                      needs_mask):
    c = pl.program_id(0)      # megacore-parallel spatial chunk
    k = pl.program_id(1)      # tile within the chunk (reduction axis)
    nk = pl.num_programs(1)

    # Output blocks (BC, 1) are resident across the k axis -> accumulators.
    @pl.when(k == 0)
    def _():
        inter_out[...] = jnp.zeros_like(inter_out)
        gnd_out[...] = jnp.zeros_like(gnd_out)
        prd_out[...] = jnp.zeros_like(prd_out)

    p = p_ref[...].astype(jnp.float32)
    t = t_ref[...].astype(jnp.float32)
    if apply_sigmoid:
        p = jax.nn.sigmoid(p)

    if needs_mask:
        # Mask the ragged tail and any duplicated overflow tile.  Applied
        # AFTER the sigmoid so garbage lanes contribute exactly zero.
        start = (c * nk + k) * tile
        lane = jax.lax.broadcasted_iota(jnp.int32, p.shape, dimension=1)
        valid = (start + lane) < total_elems
        p = jnp.where(valid, p, 0.0)
        t = jnp.where(valid, t, 0.0)

    # Per-tile lane reduction (VPU tree-adds + one XLU collapse, hidden under
    # the HBM stream) accumulated straight into the resident output blocks.
    inter_out[...] += jnp.sum(t * p, axis=-1, keepdims=True)
    if squared_pred:
        gnd_out[...] += jnp.sum(t * t, axis=-1, keepdims=True)
        prd_out[...] += jnp.sum(p * p, axis=-1, keepdims=True)
    else:
        gnd_out[...] += jnp.sum(t, axis=-1, keepdims=True)
        prd_out[...] += jnp.sum(p, axis=-1, keepdims=True)


def dice_loss_3d(pred, target, *,
                 include_background=True,
                 sigmoid=False,
                 softmax=False,
                 squared_pred=False,
                 jaccard=False,
                 reduction="mean",
                 smooth_nr=1e-5,
                 smooth_dr=1e-5,
                 spatial_tile=None,
                 num_parallel_chunks=2):
    """Matches pyzjr DiceLoss3D.forward semantics. pred/target: (N, C, D, H, W)."""
    pred = jnp.asarray(pred)      # keep native dtype; cast to f32 inside the kernel
    target = jnp.asarray(target)

    n_pred_ch = pred.shape[1]

    # Fuse the sigmoid into the kernel unless a cross-channel softmax must
    # consume the sigmoid'd values first.
    fuse_sigmoid = sigmoid and not (softmax and n_pred_ch > 1)
    if sigmoid and not fuse_sigmoid:
        pred = jax.nn.sigmoid(pred)
    if softmax:
        if n_pred_ch == 1:
            pass  # single-channel: softmax ignored (matches torch warning path)
        else:
            # TODO(synk): cross-channel softmax stays in the wrapper (it mixes
            # the channel axis, which this spatial-streaming kernel keeps whole).
            pred = jax.nn.softmax(pred, axis=1)
    if not include_background and n_pred_ch > 1:
        pred = pred[:, 1:]
        target = target[:, 1:]

    if pred.shape != target.shape:
        raise AssertionError(
            f"ground truth has different shape ({target.shape}) from input ({pred.shape})")

    B, C = pred.shape[:2]
    S = 1
    for dim in pred.shape[2:]:
        S *= dim
    BC = B * C

    p2 = pred.reshape(BC, S)
    t2 = target.reshape(BC, S)

    p_item = jnp.dtype(p2.dtype).itemsize
    t_item = jnp.dtype(t2.dtype).itemsize

    # Biggest spatial tile whose double-buffered input blocks fit the budget.
    if spatial_tile is None:
        if S <= 128:
            tile = S
        else:
            bytes_per_lane = BC * 2 * (p_item + t_item)   # 2 pipeline buffers / input
            tile = _VMEM_WORKING_SET_BUDGET // max(bytes_per_lane, 1)
            tile = min(tile, _MAX_SPATIAL_TILE, S)
            tile = max(128, (tile // 128) * 128)
    else:
        tile = int(spatial_tile)

    num_tiles = pl.cdiv(S, tile)
    num_chunks = max(1, min(int(num_parallel_chunks), num_tiles))
    tiles_per_chunk = pl.cdiv(num_tiles, num_chunks)

    # Masking is only needed when a tile reaches past S (ragged last tile, or a
    # duplicated overflow tile created by the chunk split).
    needs_mask = (S % tile != 0) or (num_tiles % num_chunks != 0)

    def _in_map(c, k):
        g = c * tiles_per_chunk + k
        g = jnp.minimum(g, num_tiles - 1)   # overflow tiles re-read a valid block; fully masked
        return (0, g)

    kernel = functools.partial(
        _dice_sums_kernel,
        total_elems=S,
        tile=tile,
        apply_sigmoid=fuse_sigmoid,
        squared_pred=squared_pred,
        needs_mask=needs_mask,
    )

    out_shapes = (
        jax.ShapeDtypeStruct((BC, num_chunks), jnp.float32),
        jax.ShapeDtypeStruct((BC, num_chunks), jnp.float32),
        jax.ShapeDtypeStruct((BC, num_chunks), jnp.float32),
    )

    inter_p, gnd_p, prd_p = pl.pallas_call(
        kernel,
        out_shape=out_shapes,
        grid_spec=pltpu.PrefetchScalarGridSpec(
            num_scalar_prefetch=0,
            grid=(num_chunks, tiles_per_chunk),
            in_specs=[
                pl.BlockSpec((BC, tile), _in_map),
                pl.BlockSpec((BC, tile), _in_map),
            ],
            out_specs=[
                pl.BlockSpec((BC, 1), lambda c, k: (0, c)),
                pl.BlockSpec((BC, 1), lambda c, k: (0, c)),
                pl.BlockSpec((BC, 1), lambda c, k: (0, c)),
            ],
        ),
        compiler_params=pltpu.CompilerParams(
            dimension_semantics=("parallel", "arbitrary"),
            vmem_limit_bytes=_VMEM_LIMIT_BYTES,
        ),
    )(p2, t2)

    # Tiny (B*C,)-sized finalization in plain JAX.
    intersection = jnp.sum(inter_p, axis=1)
    denominator = jnp.sum(gnd_p, axis=1) + jnp.sum(prd_p, axis=1)
    if jaccard:
        denominator = 2.0 * (denominator - intersection)
    f = 1.0 - (2.0 * intersection + float(smooth_nr)) / (denominator + float(smooth_dr))
    f = f.reshape(B, C)

    if reduction == "mean":
        return jnp.mean(f)
    elif reduction == "sum":
        return jnp.sum(f)
    elif reduction == "none":
        return f
    else:
        raise ValueError(f"Unsupported reduction: {reduction}")


def _reference(pred, target, *, include_background=True, sigmoid=False, softmax=False,
               squared_pred=False, jaccard=False, reduction="mean",
               smooth_nr=1e-5, smooth_dr=1e-5):
    pred = jnp.asarray(pred, jnp.float32)
    target = jnp.asarray(target, jnp.float32)
    n = pred.shape[1]
    if sigmoid:
        pred = jax.nn.sigmoid(pred)
    if softmax and n > 1:
        pred = jax.nn.softmax(pred, axis=1)
    if not include_background and n > 1:
        pred = pred[:, 1:]
        target = target[:, 1:]
    axes = tuple(range(2, pred.ndim))
    inter = jnp.sum(target * pred, axis=axes)
    if squared_pred:
        g = jnp.sum(target * target, axis=axes)
        p = jnp.sum(pred * pred, axis=axes)
    else:
        g = jnp.sum(target, axis=axes)
        p = jnp.sum(pred, axis=axes)
    denom = g + p
    if jaccard:
        denom = 2.0 * (denom - inter)
    f = 1.0 - (2.0 * inter + smooth_nr) / (denom + smooth_dr)
    if reduction == "mean":
        return jnp.mean(f)
    if reduction == "sum":
        return jnp.sum(f)
    return f


if __name__ == "__main__":
    key = jax.random.PRNGKey(0)
    k1, k2, k3, k4 = jax.random.split(key, 4)

    # Case 1: docstring-style example (integer-valued f32 preds/labels).
    batch_size, num_classes = 2, 3
    d = h = w = 8   # S = 512
    predictions = jax.random.randint(
        k1, (batch_size, num_classes, d, h, w), 0, num_classes).astype(jnp.float32)
    true_labels = jax.random.randint(
        k2, (batch_size, num_classes, d, h, w), 0, num_classes).astype(jnp.float32)
    loss1 = jax.block_until_ready(dice_loss_3d(predictions, true_labels))
    ref1 = _reference(predictions, true_labels)
    assert jnp.allclose(loss1, ref1, atol=1e-5, rtol=1e-5), (loss1, ref1)

    # Case 2: ragged spatial extent (S=729, not a multiple of 128) + bf16 logits
    # with fused sigmoid + squared_pred + jaccard, exercising the tail mask and
    # the megacore chunk split.
    d2 = h2 = w2 = 9
    logits = jax.random.normal(k3, (batch_size, num_classes, d2, h2, w2), jnp.bfloat16)
    labels2 = (jax.random.uniform(k4, (batch_size, num_classes, d2, h2, w2)) > 0.5
               ).astype(jnp.bfloat16)
    loss2 = jax.block_until_ready(
        dice_loss_3d(logits, labels2, sigmoid=True, squared_pred=True, jaccard=True))
    ref2 = _reference(logits, labels2, sigmoid=True, squared_pred=True, jaccard=True)
    assert jnp.allclose(loss2, ref2, atol=1e-4, rtol=1e-4), (loss2, ref2)

    print("KERNEL_OK")
</pallas_src>

<mosaic_0001>
module attributes {stable_mosaic.version = 11 : i64} {
  func.func @_dice_sums_kernel(%arg0: i32, %arg1: i32, %arg2: memref<6x512xf32, #tpu.memory_space<vmem>>, %arg3: memref<6x512xf32, #tpu.memory_space<vmem>>, %arg4: memref<6x1xf32, #tpu.memory_space<vmem>>, %arg5: memref<6x1xf32, #tpu.memory_space<vmem>>, %arg6: memref<6x1xf32, #tpu.memory_space<vmem>>) attributes {dimension_semantics = [#tpu.dimension_semantics<parallel>, #tpu.dimension_semantics<arbitrary>], iteration_bounds = array<i64: 1, 1>, scalar_prefetch = 0 : i64, scratch_operands = 0 : i64, tpu.core_type = #tpu.core_type<tc>, window_params = [{transform_indices = @transform_0, window_bounds = array<i64: 6, 512>}, {transform_indices = @transform_1, window_bounds = array<i64: 6, 512>}, {transform_indices = @transform_2, window_bounds = array<i64: 6, 1>}, {transform_indices = @transform_3, window_bounds = array<i64: 6, 1>}, {transform_indices = @transform_4, window_bounds = array<i64: 6, 1>}]} {
    %c0_i32 = arith.constant 0 : i32
    %0 = arith.cmpi eq, %arg1, %c0_i32 : i32
    %1 = arith.extui %0 : i1 to i32
    %c0_i32_0 = arith.constant 0 : i32
    %2 = arith.cmpi ne, %1, %c0_i32_0 : i32
    scf.if %2 {
      %cst_18 = arith.constant 0.000000e+00 : f32
      %21 = vector.broadcast %cst_18 : f32 to vector<6x1xf32>
      %c0_19 = arith.constant 0 : index
      %c0_20 = arith.constant 0 : index
      %22 = vector.load %arg4[%c0_19, %c0_20] : memref<6x1xf32, #tpu.memory_space<vmem>>, vector<6x1xf32>
      tpu.vector_store %arg4[%c0_19, %c0_20], %21 {strides = array<i32>} : memref<6x1xf32, #tpu.memory_space<vmem>>, vector<6x1xf32>,
      %cst_21 = arith.constant 0.000000e+00 : f32
      %23 = vector.broadcast %cst_21 : f32 to vector<6x1xf32>
      %c0_22 = arith.constant 0 : index
      %c0_23 = arith.constant 0 : index
      %24 = vector.load %arg5[%c0_22, %c0_23] : memref<6x1xf32, #tpu.memory_space<vmem>>, vector<6x1xf32>
      tpu.vector_store %arg5[%c0_22, %c0_23], %23 {strides = array<i32>} : memref<6x1xf32, #tpu.memory_space<vmem>>, vector<6x1xf32>,
      %cst_24 = arith.constant 0.000000e+00 : f32
      %25 = vector.broadcast %cst_24 : f32 to vector<6x1xf32>
      %c0_25 = arith.constant 0 : index
      %c0_26 = arith.constant 0 : index
      %26 = vector.load %arg6[%c0_25, %c0_26] : memref<6x1xf32, #tpu.memory_space<vmem>>, vector<6x1xf32>
      tpu.vector_store %arg6[%c0_25, %c0_26], %25 {strides = array<i32>} : memref<6x1xf32, #tpu.memory_space<vmem>>, vector<6x1xf32>,
    } else {
    }
    %c0 = arith.constant 0 : index
    %c0_1 = arith.constant 0 : index
    %3 = vector.load %arg2[%c0, %c0_1] : memref<6x512xf32, #tpu.memory_space<vmem>>, vector<6x512xf32>
    %c0_2 = arith.constant 0 : index
    %c0_3 = arith.constant 0 : index
    %4 = vector.load %arg3[%c0_2, %c0_3] : memref<6x512xf32, #tpu.memory_space<vmem>>, vector<6x512xf32>
    %c0_4 = arith.constant 0 : index
    %c0_5 = arith.constant 0 : index
    %5 = vector.load %arg4[%c0_4, %c0_5] : memref<6x1xf32, #tpu.memory_space<vmem>>, vector<6x1xf32>
    %6 = arith.mulf %4, %3 : vector<6x512xf32>
    %cst = arith.constant dense<0.000000e+00> : vector<6xf32>
    %7 = vector.multi_reduction <add>, %6, %cst [1] : vector<6x512xf32> to vector<6xf32>
    %8 = vector.shape_cast %7 : vector<6xf32> to vector<6x1xf32>
    %9 = arith.addf %5, %8 : vector<6x1xf32>
    %c0_6 = arith.constant 0 : index
    %c0_7 = arith.constant 0 : index
    %10 = vector.load %arg4[%c0_6, %c0_7] : memref<6x1xf32, #tpu.memory_space<vmem>>, vector<6x1xf32>
    tpu.vector_store %arg4[%c0_6, %c0_7], %9 {strides = array<i32>} : memref<6x1xf32, #tpu.memory_space<vmem>>, vector<6x1xf32>,
    %c0_8 = arith.constant 0 : index
    %c0_9 = arith.constant 0 : index
    %11 = vector.load %arg5[%c0_8, %c0_9] : memref<6x1xf32, #tpu.memory_space<vmem>>, vector<6x1xf32>
    %cst_10 = arith.constant dense<0.000000e+00> : vector<6xf32>
    %12 = vector.multi_reduction <add>, %4, %cst_10 [1] : vector<6x512xf32> to vector<6xf32>
    %13 = vector.shape_cast %12 : vector<6xf32> to vector<6x1xf32>
    %14 = arith.addf %11, %13 : vector<6x1xf32>
    %c0_11 = arith.constant 0 : index
    %c0_12 = arith.constant 0 : index
    %15 = vector.load %arg5[%c0_11, %c0_12] : memref<6x1xf32, #tpu.memory_space<vmem>>, vector<6x1xf32>
    tpu.vector_store %arg5[%c0_11, %c0_12], %14 {strides = array<i32>} : memref<6x1xf32, #tpu.memory_space<vmem>>, vector<6x1xf32>,
    %c0_13 = arith.constant 0 : index
    %c0_14 = arith.constant 0 : index
    %16 = vector.load %arg6[%c0_13, %c0_14] : memref<6x1xf32, #tpu.memory_space<vmem>>, vector<6x1xf32>
    %cst_15 = arith.constant dense<0.000000e+00> : vector<6xf32>
    %17 = vector.multi_reduction <add>, %3, %cst_15 [1] : vector<6x512xf32> to vector<6xf32>
    %18 = vector.shape_cast %17 : vector<6xf32> to vector<6x1xf32>
    %19 = arith.addf %16, %18 : vector<6x1xf32>
    %c0_16 = arith.constant 0 : index
    %c0_17 = arith.constant 0 : index
    %20 = vector.load %arg6[%c0_16, %c0_17] : memref<6x1xf32, #tpu.memory_space<vmem>>, vector<6x1xf32>
    tpu.vector_store %arg6[%c0_16, %c0_17], %19 {strides = array<i32>} : memref<6x1xf32, #tpu.memory_space<vmem>>, vector<6x1xf32>,
    return
  }
  func.func @transform_0(%arg0: i32, %arg1: i32) -> (i32, i32) {
    %c1_i32 = arith.constant 1 : i32
    %0 = arith.muli %arg0, %c1_i32 : i32
    %1 = arith.addi %0, %arg1 : i32
    %c0_i32 = arith.constant 0 : i32
    %2 = arith.minsi %1, %c0_i32 : i32
    %c0_i32_0 = arith.constant 0 : i32
    %c0_i32_1 = arith.constant 0 : i32
    return %c0_i32_0, %2 : i32, i32
  }
  func.func @transform_1(%arg0: i32, %arg1: i32) -> (i32, i32) {
    %c1_i32 = arith.constant 1 : i32
    %0 = arith.muli %arg0, %c1_i32 : i32
    %1 = arith.addi %0, %arg1 : i32
    %c0_i32 = arith.constant 0 : i32
    %2 = arith.minsi %1, %c0_i32 : i32
    %c0_i32_0 = arith.constant 0 : i32
    %c0_i32_1 = arith.constant 0 : i32
    return %c0_i32_0, %2 : i32, i32
  }
  func.func @transform_2(%arg0: i32, %arg1: i32) -> (i32, i32) {
    %c0_i32 = arith.constant 0 : i32
    %c0_i32_0 = arith.constant 0 : i32
    return %c0_i32, %arg0 : i32, i32
  }
  func.func @transform_3(%arg0: i32, %arg1: i32) -> (i32, i32) {
    %c0_i32 = arith.constant 0 : i32
    %c0_i32_0 = arith.constant 0 : i32
    return %c0_i32, %arg0 : i32, i32
  }
  func.func @transform_4(%arg0: i32, %arg1: i32) -> (i32, i32) {
    %c0_i32 = arith.constant 0 : i32
    %c0_i32_0 = arith.constant 0 : i32
    return %c0_i32, %arg0 : i32, i32
  }
}

</mosaic_0001>

<bundles_post_ra>
// kernel: tpu_custom_call.1
= control target key start
LH: loop header
LB: loop body
LE: loop exit
PB: predicated region body
PF: predicated region fallthrough
CT: control target
= control target key end

     0   :  { %10 = vsyncpa [#allocation3], 0  ;;  %s282_s0 = inlined_call_operand.hbm [shape: f32[6,512], index: 0, kind: input, shape index: {}]   ;;  %s283_s1 = inlined_call_operand.hbm [shape: f32[6,512], index: 1, kind: input, shape index: {}]   ;;  %s284_s2 = inlined_call_operand.vmem [shape: f32[6,1], index: 2, kind: output, shape index: {0}]   ;;  %s285_s3 = inlined_call_operand.vmem [shape: f32[6,1], index: 3, kind: output, shape index: {1}]   ;;  %s286_s4 = inlined_call_operand.vmem [shape: f32[6,1], index: 4, kind: output, shape index: {2}]  }
   0x1   :  { %11 = vsyncpa [#allocation5], 0  ;;  %s185_s15 = smov [#allocation2]   ;;  %s186_s17 = smov [#allocation4]  }
   0x2   :  { %s24_s16 = sshll.u32 %s185_s15, 4  ;;  %s40_s18 = sshll.u32 %s186_s17, 4  ;;  %s25_s16 = int_to_ptr.vmem [resolvable:$true] %s24_s16  ;;  %s41_s18 = int_to_ptr.vmem [resolvable:$true] %s40_s18 }
   0x3   :  { %s137_s21 = scalar_lea.hbm %s282_s0, 512 }
   0x4   :  { %p138_p0 = scmp.ne.s32.totalorder %s282_s0, %s137_s21  ;;  %p141_p1 = scmp.lt.u32.totalorder %s137_s21, %s282_s0 }
   0x6   :  { %p143_p2 = pnand %p141_p1, %p138_p0 }
   0x8   :  { %146 = shalt.err (!%p143_p2)
}
   0x9   :  { %s147_s26 = scalar_lea.vmem %s25_s16, 512  ;;  %p152_p4 = scmp.lt.s32.totalorder %s25_s16, %s25_s16 }
   0xa   :  { %p148_p3 = scmp.ne.s32.totalorder %s25_s16, %s147_s26  ;;  %p153_p5 = scmp.lt.s32.totalorder %s147_s26, %s147_s26 }
   0xc   :  { %p154_p6 = por %p153_p5, %p152_p4 }
   0xe   :  { %p155_p7 = pnand %p154_p6, %p148_p3 }
  0x10   :  { %158 = shalt.err (!%p155_p7)
}
  0x11   :  { %27 = dma.hbm_to_vmem [thread:$0]  %s282_s0, 512, %s25_s16, [#allocation3]  }
  0x12   :  { %s159_s5 = scalar_lea.hbm %s283_s1, 512 }
  0x13   :  { %p160_p8 = scmp.ne.s32.totalorder %s283_s1, %s159_s5  ;;  %p163_p9 = scmp.lt.u32.totalorder %s159_s5, %s283_s1 }
  0x15   :  { %p165_p10 = pnand %p163_p9, %p160_p8 }
  0x17   :  { %168 = shalt.err (!%p165_p10)
}
  0x18   :  { %s169_s10 = scalar_lea.vmem %s41_s18, 512  ;;  %p174_p12 = scmp.lt.s32.totalorder %s41_s18, %s41_s18 }
  0x19   :  { %p170_p11 = scmp.ne.s32.totalorder %s41_s18, %s169_s10  ;;  %p175_p13 = scmp.lt.s32.totalorder %s169_s10, %s169_s10 }
  0x1b   :  { %p176_p0 = por %p175_p13, %p174_p12 }
  0x1d   :  { %p177_p1 = pnand %p176_p0, %p170_p11 }
  0x1f   :  { %180 = shalt.err (!%p177_p1)
}
  0x20   :  { %43 = dma.hbm_to_vmem [thread:$0]  %s283_s1, 512, %s41_s18, [#allocation5]  }
  0x21   :  { %181 = dma.done.wait [#allocation3], 512  }
  0x22   :  { %182 = vsyncadd [#allocation3], 4294966784 }
  0x23   :  { %183 = dma.done.wait [#allocation5], 512  }
  0x24   :  { %184 = vsyncadd [#allocation5], 4294966784  ;;  %vm62_vm0 = vcmask 5120   ;;  %v187_v0 = vmov 0.0   ;;  %vm79_vm1 = vcmask 1045504  }
  0x25   :  { %63 = vst.msk [vmem:[%s284_s2] sm:$0x3f] %vm62_vm0, %v187_v0  ;;  %64 = vst.msk [vmem:[%s285_s3] sm:$0x3f] %vm62_vm0, %v187_v0  ;;  %v66_v1 = vld [vmem:[#allocation2] sm:$0x3f] }
  0x26   :  { %65 = vst.msk [vmem:[%s286_s4] sm:$0x3f] %vm62_vm0, %v187_v0  ;;  %v67_v2 = vld [vmem:[#allocation2 + $0x8] sm:$0x3f]  ;;  %v68_v3 = vld [vmem:[#allocation2 + $0x10] sm:$0x3f] }
  0x27   :  { %v69_v4 = vld [vmem:[#allocation2 + $0x18] sm:$0x3f]  ;;  %v70_v5 = vld [vmem:[#allocation4] sm:$0x3f]  ;;  %v71_v6 = vld [vmem:[#allocation4 + $0x8] sm:$0x3f] }
  0x28   :  { %v72_v7 = vld [vmem:[#allocation4 + $0x10] sm:$0x3f]  ;;  %v73_v8 = vld [vmem:[#allocation4 + $0x18] sm:$0x3f]  ;;  %v75_v9 = vmul.f32 %v70_v5, %v66_v1  ;;  %v76_v10 = vmul.f32 %v71_v6, %v67_v2  ;;  %v105_v11 = vsel %vm79_vm1, %v66_v1, 0.0  ;;  %v106_v12 = vsel %vm79_vm1, %v67_v2, 0.0 }
  0x29   :  { %v77_v13 = vmul.f32 %v72_v7, %v68_v3  ;;  %v78_v14 = vmul.f32 %v73_v8, %v69_v4  ;;  %v107_v15 = vadd.f32 %v106_v12, %v105_v11  ;;  %v108_v16 = vsel %vm79_vm1, %v68_v3, 0.0 }
  0x2a   :  { %v80_v17 = vsel %vm79_vm1, %v75_v9, 0.0  ;;  %v81_v18 = vsel %vm79_vm1, %v76_v10, 0.0  ;;  %v110_v19 = vsel %vm79_vm1, %v69_v4, 0.0  ;;  %v93_v20 = vsel %vm79_vm1, %v70_v5, 0.0 }
  0x2b   :  { %v82_v21 = vadd.f32 %v81_v18, %v80_v17  ;;  %v83_v22 = vsel %vm79_vm1, %v77_v13, 0.0  ;;  %v109_v23 = vadd.f32 %v108_v16, %v107_v15  ;;  %v85_v24 = vsel %vm79_vm1, %v78_v14, 0.0 }
  0x2c   :  { %v94_v25 = vsel %vm79_vm1, %v71_v6, 0.0  ;;  %v96_v26 = vsel %vm79_vm1, %v72_v7, 0.0  ;;  %v98_v30 = vsel %vm79_vm1, %v73_v8, 0.0  ;;  %v74_v35 = vld [vmem:[%s284_s2] sm:$0x3f] }
  0x2d   :  { %v84_v27 = vadd.f32 %v83_v22, %v82_v21  ;;  %v111_v28 = vadd.f32 %v110_v19, %v109_v23  ;;  %v95_v29 = vadd.f32 %v94_v25, %v93_v20  ;;  %v104_v34 = vld [vmem:[%s286_s4] sm:$0x3f] }
  0x2e   :  { %v92_v40 = vld [vmem:[%s285_s3] sm:$0x3f] }
  0x2f   :  { %v86_v31 = vadd.f32 %v85_v24, %v84_v27  ;;  %112 = vadd.xlane.f32.xlu1 %v111_v28  ;;  %v97_v32 = vadd.f32 %v96_v26, %v95_v29 }
  0x31   :  { %87 = vadd.xlane.f32.xlu0 %v86_v31  ;;  %v99_v33 = vadd.f32 %v98_v30, %v97_v32 }
  0x35   :  { %100 = vadd.xlane.f32.xlu0 %v99_v33 }
  0xbc   :  { %v113_v36 = vpop.xlane.xlu1 %112 }
  0xbd   :  { %v114_v37 = vadd.f32 %v113_v36, %v104_v34 }
  0xbe   :  { %v88_v38 = vpop.xlane.xlu0 %87 }
  0xbf   :  { %v89_v39 = vadd.f32 %v88_v38, %v74_v35  ;;  %115 = vst.msk [vmem:[%s286_s4] sm:$0x3f] %vm62_vm0, %v114_v37 }
  0xc1   :  { %91 = vst.msk [vmem:[%s284_s2] sm:$0x3f] %vm62_vm0, %v89_v39 }
  0xc2   :  { %v101_v41 = vpop.xlane.xlu0 %100 }
  0xc3   :  { %v102_v42 = vadd.f32 %v101_v41, %v92_v40 }
  0xc5   :  { %103 = vst.msk [vmem:[%s285_s3] sm:$0x3f] %vm62_vm0, %v102_v42 }
  0xc6   :  { %128 = vsyncpa [#allocation3], 1 }
  0xc7   :  { %129 = vsyncpa [#allocation5], 1 }

</bundles_post_ra>
